<compile_context>
chip_gen: v7x
topology: tpu7x:2x2x1
jax: 0.10.0
libtpu: 0.0.40
codegen_flags: <defaults>
</compile_context>

<pallas_src>
import functools

import numpy as np
import jax
import jax.numpy as jnp
from jax.experimental import pallas as pl
from jax.experimental.pallas import tpu as pltpu


def _round_up(n, m):
    return ((n + m - 1) // m) * m


# --------------------------------------------------------------------------
# Fused kernel: maxpool(2) -> [conv3x3 + BN + PReLU] x 2
# --------------------------------------------------------------------------

def down_kernel(x_ref, masks_ref, w1_ref, w2_ref, gba_ref, o_ref, *, Wp, eps):
    # x_ref    : (4, Cpad1, L)  2x2 pool-window slabs, channel-major, L = N*Hp*Wp
    # masks_ref: (9, L)         im2col halo-validity masks, (dy, dx) order
    # w*_ref   : (Cout, 9*Cin_pad)   K ordered (dy, dx, ci)
    # gba_ref  : (2, Cout, 3)   per-layer [gamma, beta, alpha]
    # o_ref    : (Cout, L)
    L = x_ref.shape[-1]
    inv_L = 1.0 / L

    x = x_ref[...]
    # ---- MaxPool2d(2): 3 elementwise maxes over the 4 window slabs ----
    pooled = jnp.maximum(jnp.maximum(x[0], x[1]), jnp.maximum(x[2], x[3]))  # (Cpad1, L)

    masks = masks_ref[...]          # (9, L)
    gba = gba_ref[...]              # (2, Cout, 3)

    def im2col(a):
        # a: (C, L) -> (9*C, L); zero halo == padding=1.  Lane rotates hit the
        # XLU slot (effectively free); masks are precomputed constants.
        taps = []
        k = 0
        for dy in (-1, 0, 1):
            for dx in (-1, 0, 1):
                off = dy * Wp + dx
                shifted = a if off == 0 else pltpu.roll(a, (-off) % L, axis=1)
                taps.append(shifted * masks[k:k + 1, :])
                k += 1
        return jnp.concatenate(taps, axis=0)

    def conv_bn_prelu(a, w, layer):
        cin = w.shape[1] // 9
        if a.shape[0] < cin:        # sublane-align input channels if needed
            a = jnp.concatenate(
                [a, jnp.zeros((cin - a.shape[0], a.shape[1]), a.dtype)], axis=0)
        patch = im2col(a)                                          # (9*cin, L)
        # single im2col matmul, f32 accumulation on the MXU (full-precision path)
        y = jnp.dot(w, patch, preferred_element_type=jnp.float32,
                    precision=jax.lax.Precision.HIGHEST)           # (Cout, L)
        # BatchNorm2d, training-mode batch stats (biased variance), one pass.
        # Conv bias intentionally omitted: it cancels in (y - mean(y)).
        s1 = jnp.sum(y, axis=1, keepdims=True)
        s2 = jnp.sum(y * y, axis=1, keepdims=True)
        mu = s1 * inv_L
        var = s2 * inv_L - mu * mu
        gamma = gba[layer, :, 0:1]                                 # (Cout, 1)
        beta = gba[layer, :, 1:2]                                  # (Cout, 1)
        alpha = gba[layer, 0:1, 2:3]                               # (1, 1) shared PReLU alpha
        scale = gamma * jax.lax.rsqrt(var + eps)                   # gamma folded into scale
        z = (y - mu) * scale + beta
        return jnp.where(z > 0, z, alpha * z)                      # PReLU: single select

    h = conv_bn_prelu(pooled, w1_ref[...], 0)                      # (Cout, L)
    h = conv_bn_prelu(h, w2_ref[...], 1)                           # (Cout, L)
    o_ref[...] = h.astype(o_ref.dtype)                             # lane-dense store


# --------------------------------------------------------------------------
# Wrapper
# --------------------------------------------------------------------------

def _prep_conv_weight(w_oihw):
    # torch conv weight (Cout, Cin, 3, 3) -> (Cout, 9*Cpad), K ordered (dy, dx, ci),
    # input channels zero-padded to a multiple of 8 for sublane alignment.
    cout, cin = w_oihw.shape[0], w_oihw.shape[1]
    cpad = _round_up(cin, 8)
    w = jnp.transpose(w_oihw, (0, 2, 3, 1))                        # (Cout, 3, 3, Cin)
    w = jnp.pad(w, ((0, 0), (0, 0), (0, 0), (0, cpad - cin)))
    return w.reshape(cout, 9 * cpad)


def _pack_small(p, cout):
    # [gamma, beta, alpha(broadcast)] per channel.  Conv bias is dropped on purpose
    # (it has no effect under training-mode BatchNorm).
    return jnp.stack([p["gamma"],
                      p["beta"],
                      jnp.broadcast_to(p["alpha"], (cout,))], axis=1)   # (Cout, 3)


def down_forward(x_nchw, params, eps=1e-5):
    N, Cin, H, W = x_nchw.shape
    assert H % 2 == 0 and W % 2 == 0
    Hp, Wp = H // 2, W // 2
    L = N * Hp * Wp
    Cout = params["conv1"]["w"].shape[0]
    Cpad1 = _round_up(Cin, 8)

    # Expose the 2x2 pool window as a leading axis: (4, Cpad1, L), channel-major;
    # lane index = n*Hp*Wp + y*Wp + x (lane-dense: L = 128 here).
    x6 = x_nchw.reshape(N, Cin, Hp, 2, Wp, 2)
    x4 = jnp.transpose(x6, (3, 5, 1, 0, 2, 4)).reshape(4, Cin, L)
    x4 = jnp.pad(x4, ((0, 0), (0, Cpad1 - Cin), (0, 0)))

    # Static 0/1 halo-validity masks for the nine 3x3 taps (trace-time constants).
    l = np.arange(L)
    yy = (l % (Hp * Wp)) // Wp
    xx = l % Wp
    masks = np.stack([
        ((yy + dy >= 0) & (yy + dy < Hp) & (xx + dx >= 0) & (xx + dx < Wp))
        for dy in (-1, 0, 1) for dx in (-1, 0, 1)
    ]).astype(np.float32)                                          # (9, L)

    w1 = _prep_conv_weight(params["conv1"]["w"])                   # (Cout, 9*Cpad1)
    w2 = _prep_conv_weight(params["conv2"]["w"])                   # (Cout, 9*Cpad2)
    gba = jnp.stack([_pack_small(params["conv1"], Cout),
                     _pack_small(params["conv2"], Cout)])          # (2, Cout, 3)

    kernel = functools.partial(down_kernel, Wp=Wp, eps=eps)
    out_cm = pl.pallas_call(
        kernel,
        out_shape=jax.ShapeDtypeStruct((Cout, L), jnp.float32),
    )(x4, jnp.asarray(masks), w1, w2, gba)

    # (Cout, N*Hp*Wp) -> NCHW
    return jnp.transpose(out_cm.reshape(Cout, N, Hp, Wp), (1, 0, 2, 3))


# --------------------------------------------------------------------------
# Parameters (deterministic, synthetic — matches nn.Module shapes)
# --------------------------------------------------------------------------

def init_conv_layer_params(key, cin, cout):
    kw, kb = jax.random.split(key)
    bound = (1.0 / (cin * 9)) ** 0.5
    return dict(
        w=jax.random.uniform(kw, (cout, cin, 3, 3), jnp.float32, -bound, bound),
        b=jax.random.uniform(kb, (cout,), jnp.float32, -bound, bound),
        gamma=jnp.ones((cout,), jnp.float32),
        beta=jnp.zeros((cout,), jnp.float32),
        alpha=jnp.full((1,), 0.25, jnp.float32),   # PReLU default init
    )


def init_down_params(key, in_channels, out_channels):
    k1, k2 = jax.random.split(key)
    return dict(conv1=init_conv_layer_params(k1, in_channels, out_channels),
                conv2=init_conv_layer_params(k2, out_channels, out_channels))


# --------------------------------------------------------------------------
# Pure-JAX reference (mirrors the PyTorch module, training-mode BN, WITH bias —
# this also validates that dropping the bias inside the kernel is exact)
# --------------------------------------------------------------------------

def down_reference(x, params, eps=1e-5):
    h = jax.lax.reduce_window(x, -jnp.inf, jax.lax.max,
                              (1, 1, 2, 2), (1, 1, 2, 2), "VALID")

    def conv_layer(h, p):
        y = jax.lax.conv_general_dilated(
            h, p["w"], window_strides=(1, 1), padding=((1, 1), (1, 1)),
            dimension_numbers=("NCHW", "OIHW", "NCHW"),
            precision=jax.lax.Precision.HIGHEST)
        y = y + p["b"].reshape(1, -1, 1, 1)
        mu = jnp.mean(y, axis=(0, 2, 3), keepdims=True)
        var = jnp.mean((y - mu) ** 2, axis=(0, 2, 3), keepdims=True)
        z = (y - mu) * jax.lax.rsqrt(var + eps)
        z = z * p["gamma"].reshape(1, -1, 1, 1) + p["beta"].reshape(1, -1, 1, 1)
        return jnp.maximum(z, 0.0) + p["alpha"].reshape(1, 1, 1, 1) * jnp.minimum(z, 0.0)

    h = conv_layer(h, params["conv1"])
    h = conv_layer(h, params["conv2"])
    return h


# --------------------------------------------------------------------------
# Main
# --------------------------------------------------------------------------

if __name__ == "__main__":
    key = jax.random.PRNGKey(0)
    kx, kp = jax.random.split(key)

    N, Cin, H, W = 2, 4, 16, 16
    Cout = 8

    x = jax.random.normal(kx, (N, Cin, H, W), jnp.float32)
    params = init_down_params(kp, Cin, Cout)

    down = jax.jit(down_forward)
    y = jax.block_until_ready(down(x, params))

    assert y.shape == (N, Cout, H // 2, W // 2), y.shape
    assert bool(jnp.all(jnp.isfinite(y)))

    # correctness vs. pure-JAX reference (all-f32 path -> tight tolerance)
    y_ref = jax.block_until_ready(down_reference(x, params))
    err = float(jnp.max(jnp.abs(y - y_ref)))
    assert err < 1e-3, f"max abs error vs reference: {err}"

    print("KERNEL_OK")
</pallas_src>

<mosaic_0001>
module attributes {stable_mosaic.version = 11 : i64} {
  func.func @down_kernel(%arg0: memref<4x8x128xf32, #tpu.memory_space<vmem>>, %arg1: memref<9x128xf32, #tpu.memory_space<vmem>>, %arg2: memref<8x72xf32, #tpu.memory_space<vmem>>, %arg3: memref<8x72xf32, #tpu.memory_space<vmem>>, %arg4: memref<2x8x3xf32, #tpu.memory_space<vmem>>, %arg5: memref<8x128xf32, #tpu.memory_space<vmem>>) attributes {dimension_semantics = [], scalar_prefetch = 0 : i64, scratch_operands = 0 : i64, tpu.core_type = #tpu.core_type<tc>} {
    %c0 = arith.constant 0 : index
    %c0_0 = arith.constant 0 : index
    %c0_1 = arith.constant 0 : index
    %0 = vector.load %arg0[%c0, %c0_0, %c0_1] : memref<4x8x128xf32, #tpu.memory_space<vmem>>, vector<4x8x128xf32>
    %1 = vector.extract_strided_slice %0 {offsets = [0, 0, 0], sizes = [1, 8, 128], strides = [1, 1, 1]} : vector<4x8x128xf32> to vector<1x8x128xf32>
    %2 = vector.shape_cast %1 : vector<1x8x128xf32> to vector<8x128xf32>
    %3 = vector.extract_strided_slice %0 {offsets = [1, 0, 0], sizes = [1, 8, 128], strides = [1, 1, 1]} : vector<4x8x128xf32> to vector<1x8x128xf32>
    %4 = vector.shape_cast %3 : vector<1x8x128xf32> to vector<8x128xf32>
    %5 = arith.maximumf %2, %4 : vector<8x128xf32>
    %6 = vector.extract_strided_slice %0 {offsets = [2, 0, 0], sizes = [1, 8, 128], strides = [1, 1, 1]} : vector<4x8x128xf32> to vector<1x8x128xf32>
    %7 = vector.shape_cast %6 : vector<1x8x128xf32> to vector<8x128xf32>
    %8 = vector.extract_strided_slice %0 {offsets = [3, 0, 0], sizes = [1, 8, 128], strides = [1, 1, 1]} : vector<4x8x128xf32> to vector<1x8x128xf32>
    %9 = vector.shape_cast %8 : vector<1x8x128xf32> to vector<8x128xf32>
    %10 = arith.maximumf %7, %9 : vector<8x128xf32>
    %11 = arith.maximumf %5, %10 : vector<8x128xf32>
    %c0_2 = arith.constant 0 : index
    %c0_3 = arith.constant 0 : index
    %12 = vector.load %arg1[%c0_2, %c0_3] : memref<9x128xf32, #tpu.memory_space<vmem>>, vector<9x128xf32>
    %c0_4 = arith.constant 0 : index
    %c0_5 = arith.constant 0 : index
    %c0_6 = arith.constant 0 : index
    %13 = vector.load %arg4[%c0_4, %c0_5, %c0_6] : memref<2x8x3xf32, #tpu.memory_space<vmem>>, vector<2x8x3xf32>
    %c0_7 = arith.constant 0 : index
    %c0_8 = arith.constant 0 : index
    %14 = vector.load %arg2[%c0_7, %c0_8] : memref<8x72xf32, #tpu.memory_space<vmem>>, vector<8x72xf32>
    %c9_i32 = arith.constant 9 : i32
    %15 = tpu.dynamic_rotate %11 by %c9_i32 dim 1 : vector<8x128xf32>, i32 -> vector<8x128xf32>
    %16 = vector.extract_strided_slice %12 {offsets = [0, 0], sizes = [1, 128], strides = [1, 1]} : vector<9x128xf32> to vector<1x128xf32>
    %17 = vector.broadcast %16 : vector<1x128xf32> to vector<8x128xf32>
    %18 = arith.mulf %15, %17 : vector<8x128xf32>
    %c8_i32 = arith.constant 8 : i32
    %19 = tpu.dynamic_rotate %11 by %c8_i32 dim 1 : vector<8x128xf32>, i32 -> vector<8x128xf32>
    %20 = vector.extract_strided_slice %12 {offsets = [1, 0], sizes = [1, 128], strides = [1, 1]} : vector<9x128xf32> to vector<1x128xf32>
    %21 = vector.broadcast %20 : vector<1x128xf32> to vector<8x128xf32>
    %22 = arith.mulf %19, %21 : vector<8x128xf32>
    %c7_i32 = arith.constant 7 : i32
    %23 = tpu.dynamic_rotate %11 by %c7_i32 dim 1 : vector<8x128xf32>, i32 -> vector<8x128xf32>
    %24 = vector.extract_strided_slice %12 {offsets = [2, 0], sizes = [1, 128], strides = [1, 1]} : vector<9x128xf32> to vector<1x128xf32>
    %25 = vector.broadcast %24 : vector<1x128xf32> to vector<8x128xf32>
    %26 = arith.mulf %23, %25 : vector<8x128xf32>
    %c1_i32 = arith.constant 1 : i32
    %27 = tpu.dynamic_rotate %11 by %c1_i32 dim 1 : vector<8x128xf32>, i32 -> vector<8x128xf32>
    %28 = vector.extract_strided_slice %12 {offsets = [3, 0], sizes = [1, 128], strides = [1, 1]} : vector<9x128xf32> to vector<1x128xf32>
    %29 = vector.broadcast %28 : vector<1x128xf32> to vector<8x128xf32>
    %30 = arith.mulf %27, %29 : vector<8x128xf32>
    %31 = vector.extract_strided_slice %12 {offsets = [4, 0], sizes = [1, 128], strides = [1, 1]} : vector<9x128xf32> to vector<1x128xf32>
    %32 = vector.broadcast %31 : vector<1x128xf32> to vector<8x128xf32>
    %33 = arith.mulf %11, %32 : vector<8x128xf32>
    %c127_i32 = arith.constant 127 : i32
    %34 = tpu.dynamic_rotate %11 by %c127_i32 dim 1 : vector<8x128xf32>, i32 -> vector<8x128xf32>
    %35 = vector.extract_strided_slice %12 {offsets = [5, 0], sizes = [1, 128], strides = [1, 1]} : vector<9x128xf32> to vector<1x128xf32>
    %36 = vector.broadcast %35 : vector<1x128xf32> to vector<8x128xf32>
    %37 = arith.mulf %34, %36 : vector<8x128xf32>
    %c121_i32 = arith.constant 121 : i32
    %38 = tpu.dynamic_rotate %11 by %c121_i32 dim 1 : vector<8x128xf32>, i32 -> vector<8x128xf32>
    %39 = vector.extract_strided_slice %12 {offsets = [6, 0], sizes = [1, 128], strides = [1, 1]} : vector<9x128xf32> to vector<1x128xf32>
    %40 = vector.broadcast %39 : vector<1x128xf32> to vector<8x128xf32>
    %41 = arith.mulf %38, %40 : vector<8x128xf32>
    %c120_i32 = arith.constant 120 : i32
    %42 = tpu.dynamic_rotate %11 by %c120_i32 dim 1 : vector<8x128xf32>, i32 -> vector<8x128xf32>
    %43 = vector.extract_strided_slice %12 {offsets = [7, 0], sizes = [1, 128], strides = [1, 1]} : vector<9x128xf32> to vector<1x128xf32>
    %44 = vector.broadcast %43 : vector<1x128xf32> to vector<8x128xf32>
    %45 = arith.mulf %42, %44 : vector<8x128xf32>
    %c119_i32 = arith.constant 119 : i32
    %46 = tpu.dynamic_rotate %11 by %c119_i32 dim 1 : vector<8x128xf32>, i32 -> vector<8x128xf32>
    %47 = vector.extract_strided_slice %12 {offsets = [8, 0], sizes = [1, 128], strides = [1, 1]} : vector<9x128xf32> to vector<1x128xf32>
    %48 = vector.broadcast %47 : vector<1x128xf32> to vector<8x128xf32>
    %49 = arith.mulf %46, %48 : vector<8x128xf32>
    %50 = tpu.concatenate %18, %22, %26, %30, %33, %37, %41, %45, %49 in 0 : vector<8x128xf32>, vector<8x128xf32>, vector<8x128xf32>, vector<8x128xf32>, vector<8x128xf32>, vector<8x128xf32>, vector<8x128xf32>, vector<8x128xf32>, vector<8x128xf32> -> vector<72x128xf32>
    %cst = arith.constant dense<0.000000e+00> : vector<8x128xf32>
    %51 = tpu.matmul %14, %50, %cst {dimension_numbers = #tpu.dot_dimension_numbers<[1], [0], [0], [1], [0, 0, 1, 1], [], []>, precision = #tpu.contract_precision<fp32>} : vector<8x72xf32>, vector<72x128xf32>, vector<8x128xf32> -> vector<8x128xf32>
    %cst_9 = arith.constant dense<0.000000e+00> : vector<8xf32>
    %52 = vector.multi_reduction <add>, %51, %cst_9 [1] : vector<8x128xf32> to vector<8xf32>
    %53 = vector.shape_cast %52 : vector<8xf32> to vector<8x1xf32>
    %54 = arith.mulf %51, %51 : vector<8x128xf32>
    %cst_10 = arith.constant dense<0.000000e+00> : vector<8xf32>
    %55 = vector.multi_reduction <add>, %54, %cst_10 [1] : vector<8x128xf32> to vector<8xf32>
    %56 = vector.shape_cast %55 : vector<8xf32> to vector<8x1xf32>
    %cst_11 = arith.constant 7.812500e-03 : f32
    %57 = vector.broadcast %cst_11 : f32 to vector<8x1xf32>
    %58 = arith.mulf %53, %57 : vector<8x1xf32>
    %cst_12 = arith.constant 7.812500e-03 : f32
    %59 = vector.broadcast %cst_12 : f32 to vector<8x1xf32>
    %60 = arith.mulf %56, %59 : vector<8x1xf32>
    %61 = arith.mulf %58, %58 : vector<8x1xf32>
    %62 = arith.subf %60, %61 : vector<8x1xf32>
    %63 = vector.extract_strided_slice %13 {offsets = [0, 0, 0], sizes = [1, 8, 1], strides = [1, 1, 1]} : vector<2x8x3xf32> to vector<1x8x1xf32>
    %64 = vector.shape_cast %63 : vector<1x8x1xf32> to vector<8x1xf32>
    %65 = vector.extract_strided_slice %13 {offsets = [0, 0, 1], sizes = [1, 8, 1], strides = [1, 1, 1]} : vector<2x8x3xf32> to vector<1x8x1xf32>
    %66 = vector.shape_cast %65 : vector<1x8x1xf32> to vector<8x1xf32>
    %67 = vector.extract_strided_slice %13 {offsets = [0, 0, 2], sizes = [1, 1, 1], strides = [1, 1, 1]} : vector<2x8x3xf32> to vector<1x1x1xf32>
    %68 = vector.shape_cast %67 : vector<1x1x1xf32> to vector<1x1xf32>
    %cst_13 = arith.constant 9.99999974E-6 : f32
    %69 = vector.broadcast %cst_13 : f32 to vector<8x1xf32>
    %70 = arith.addf %62, %69 : vector<8x1xf32>
    %71 = math.rsqrt %70 : vector<8x1xf32>
    %72 = arith.mulf %64, %71 : vector<8x1xf32>
    %73 = vector.broadcast %58 : vector<8x1xf32> to vector<8x128xf32>
    %74 = arith.subf %51, %73 : vector<8x128xf32>
    %75 = vector.broadcast %72 : vector<8x1xf32> to vector<8x128xf32>
    %76 = arith.mulf %74, %75 : vector<8x128xf32>
    %77 = vector.broadcast %66 : vector<8x1xf32> to vector<8x128xf32>
    %78 = arith.addf %76, %77 : vector<8x128xf32>
    %cst_14 = arith.constant 0.000000e+00 : f32
    %79 = vector.broadcast %cst_14 : f32 to vector<8x128xf32>
    %80 = arith.cmpf ogt, %78, %79 : vector<8x128xf32>
    %81 = vector.broadcast %68 : vector<1x1xf32> to vector<8x128xf32>
    %82 = arith.mulf %81, %78 : vector<8x128xf32>
    %83 = arith.select %80, %78, %82 : vector<8x128xi1>, vector<8x128xf32>
    %c0_15 = arith.constant 0 : index
    %c0_16 = arith.constant 0 : index
    %84 = vector.load %arg3[%c0_15, %c0_16] : memref<8x72xf32, #tpu.memory_space<vmem>>, vector<8x72xf32>
    %c9_i32_17 = arith.constant 9 : i32
    %85 = tpu.dynamic_rotate %83 by %c9_i32_17 dim 1 : vector<8x128xf32>, i32 -> vector<8x128xf32>
    %86 = vector.extract_strided_slice %12 {offsets = [0, 0], sizes = [1, 128], strides = [1, 1]} : vector<9x128xf32> to vector<1x128xf32>
    %87 = vector.broadcast %86 : vector<1x128xf32> to vector<8x128xf32>
    %88 = arith.mulf %85, %87 : vector<8x128xf32>
    %c8_i32_18 = arith.constant 8 : i32
    %89 = tpu.dynamic_rotate %83 by %c8_i32_18 dim 1 : vector<8x128xf32>, i32 -> vector<8x128xf32>
    %90 = vector.extract_strided_slice %12 {offsets = [1, 0], sizes = [1, 128], strides = [1, 1]} : vector<9x128xf32> to vector<1x128xf32>
    %91 = vector.broadcast %90 : vector<1x128xf32> to vector<8x128xf32>
    %92 = arith.mulf %89, %91 : vector<8x128xf32>
    %c7_i32_19 = arith.constant 7 : i32
    %93 = tpu.dynamic_rotate %83 by %c7_i32_19 dim 1 : vector<8x128xf32>, i32 -> vector<8x128xf32>
    %94 = vector.extract_strided_slice %12 {offsets = [2, 0], sizes = [1, 128], strides = [1, 1]} : vector<9x128xf32> to vector<1x128xf32>
    %95 = vector.broadcast %94 : vector<1x128xf32> to vector<8x128xf32>
    %96 = arith.mulf %93, %95 : vector<8x128xf32>
    %c1_i32_20 = arith.constant 1 : i32
    %97 = tpu.dynamic_rotate %83 by %c1_i32_20 dim 1 : vector<8x128xf32>, i32 -> vector<8x128xf32>
    %98 = vector.extract_strided_slice %12 {offsets = [3, 0], sizes = [1, 128], strides = [1, 1]} : vector<9x128xf32> to vector<1x128xf32>
    %99 = vector.broadcast %98 : vector<1x128xf32> to vector<8x128xf32>
    %100 = arith.mulf %97, %99 : vector<8x128xf32>
    %101 = vector.extract_strided_slice %12 {offsets = [4, 0], sizes = [1, 128], strides = [1, 1]} : vector<9x128xf32> to vector<1x128xf32>
    %102 = vector.broadcast %101 : vector<1x128xf32> to vector<8x128xf32>
    %103 = arith.mulf %83, %102 : vector<8x128xf32>
    %c127_i32_21 = arith.constant 127 : i32
    %104 = tpu.dynamic_rotate %83 by %c127_i32_21 dim 1 : vector<8x128xf32>, i32 -> vector<8x128xf32>
    %105 = vector.extract_strided_slice %12 {offsets = [5, 0], sizes = [1, 128], strides = [1, 1]} : vector<9x128xf32> to vector<1x128xf32>
    %106 = vector.broadcast %105 : vector<1x128xf32> to vector<8x128xf32>
    %107 = arith.mulf %104, %106 : vector<8x128xf32>
    %c121_i32_22 = arith.constant 121 : i32
    %108 = tpu.dynamic_rotate %83 by %c121_i32_22 dim 1 : vector<8x128xf32>, i32 -> vector<8x128xf32>
    %109 = vector.extract_strided_slice %12 {offsets = [6, 0], sizes = [1, 128], strides = [1, 1]} : vector<9x128xf32> to vector<1x128xf32>
    %110 = vector.broadcast %109 : vector<1x128xf32> to vector<8x128xf32>
    %111 = arith.mulf %108, %110 : vector<8x128xf32>
    %c120_i32_23 = arith.constant 120 : i32
    %112 = tpu.dynamic_rotate %83 by %c120_i32_23 dim 1 : vector<8x128xf32>, i32 -> vector<8x128xf32>
    %113 = vector.extract_strided_slice %12 {offsets = [7, 0], sizes = [1, 128], strides = [1, 1]} : vector<9x128xf32> to vector<1x128xf32>
    %114 = vector.broadcast %113 : vector<1x128xf32> to vector<8x128xf32>
    %115 = arith.mulf %112, %114 : vector<8x128xf32>
    %c119_i32_24 = arith.constant 119 : i32
    %116 = tpu.dynamic_rotate %83 by %c119_i32_24 dim 1 : vector<8x128xf32>, i32 -> vector<8x128xf32>
    %117 = vector.extract_strided_slice %12 {offsets = [8, 0], sizes = [1, 128], strides = [1, 1]} : vector<9x128xf32> to vector<1x128xf32>
    %118 = vector.broadcast %117 : vector<1x128xf32> to vector<8x128xf32>
    %119 = arith.mulf %116, %118 : vector<8x128xf32>
    %120 = tpu.concatenate %88, %92, %96, %100, %103, %107, %111, %115, %119 in 0 : vector<8x128xf32>, vector<8x128xf32>, vector<8x128xf32>, vector<8x128xf32>, vector<8x128xf32>, vector<8x128xf32>, vector<8x128xf32>, vector<8x128xf32>, vector<8x128xf32> -> vector<72x128xf32>
    %cst_25 = arith.constant dense<0.000000e+00> : vector<8x128xf32>
    %121 = tpu.matmul %84, %120, %cst_25 {dimension_numbers = #tpu.dot_dimension_numbers<[1], [0], [0], [1], [0, 0, 1, 1], [], []>, precision = #tpu.contract_precision<fp32>} : vector<8x72xf32>, vector<72x128xf32>, vector<8x128xf32> -> vector<8x128xf32>
    %cst_26 = arith.constant dense<0.000000e+00> : vector<8xf32>
    %122 = vector.multi_reduction <add>, %121, %cst_26 [1] : vector<8x128xf32> to vector<8xf32>
    %123 = vector.shape_cast %122 : vector<8xf32> to vector<8x1xf32>
    %124 = arith.mulf %121, %121 : vector<8x128xf32>
    %cst_27 = arith.constant dense<0.000000e+00> : vector<8xf32>
    %125 = vector.multi_reduction <add>, %124, %cst_27 [1] : vector<8x128xf32> to vector<8xf32>
    %126 = vector.shape_cast %125 : vector<8xf32> to vector<8x1xf32>
    %cst_28 = arith.constant 7.812500e-03 : f32
    %127 = vector.broadcast %cst_28 : f32 to vector<8x1xf32>
    %128 = arith.mulf %123, %127 : vector<8x1xf32>
    %cst_29 = arith.constant 7.812500e-03 : f32
    %129 = vector.broadcast %cst_29 : f32 to vector<8x1xf32>
    %130 = arith.mulf %126, %129 : vector<8x1xf32>
    %131 = arith.mulf %128, %128 : vector<8x1xf32>
    %132 = arith.subf %130, %131 : vector<8x1xf32>
    %133 = vector.extract_strided_slice %13 {offsets = [1, 0, 0], sizes = [1, 8, 1], strides = [1, 1, 1]} : vector<2x8x3xf32> to vector<1x8x1xf32>
    %134 = vector.shape_cast %133 : vector<1x8x1xf32> to vector<8x1xf32>
    %135 = vector.extract_strided_slice %13 {offsets = [1, 0, 1], sizes = [1, 8, 1], strides = [1, 1, 1]} : vector<2x8x3xf32> to vector<1x8x1xf32>
    %136 = vector.shape_cast %135 : vector<1x8x1xf32> to vector<8x1xf32>
    %137 = vector.extract_strided_slice %13 {offsets = [1, 0, 2], sizes = [1, 1, 1], strides = [1, 1, 1]} : vector<2x8x3xf32> to vector<1x1x1xf32>
    %138 = vector.shape_cast %137 : vector<1x1x1xf32> to vector<1x1xf32>
    %cst_30 = arith.constant 9.99999974E-6 : f32
    %139 = vector.broadcast %cst_30 : f32 to vector<8x1xf32>
    %140 = arith.addf %132, %139 : vector<8x1xf32>
    %141 = math.rsqrt %140 : vector<8x1xf32>
    %142 = arith.mulf %134, %141 : vector<8x1xf32>
    %143 = vector.broadcast %128 : vector<8x1xf32> to vector<8x128xf32>
    %144 = arith.subf %121, %143 : vector<8x128xf32>
    %145 = vector.broadcast %142 : vector<8x1xf32> to vector<8x128xf32>
    %146 = arith.mulf %144, %145 : vector<8x128xf32>
    %147 = vector.broadcast %136 : vector<8x1xf32> to vector<8x128xf32>
    %148 = arith.addf %146, %147 : vector<8x128xf32>
    %cst_31 = arith.constant 0.000000e+00 : f32
    %149 = vector.broadcast %cst_31 : f32 to vector<8x128xf32>
    %150 = arith.cmpf ogt, %148, %149 : vector<8x128xf32>
    %151 = vector.broadcast %138 : vector<1x1xf32> to vector<8x128xf32>
    %152 = arith.mulf %151, %148 : vector<8x128xf32>
    %153 = arith.select %150, %148, %152 : vector<8x128xi1>, vector<8x128xf32>
    %c0_32 = arith.constant 0 : index
    %c0_33 = arith.constant 0 : index
    %154 = vector.load %arg5[%c0_32, %c0_33] : memref<8x128xf32, #tpu.memory_space<vmem>>, vector<8x128xf32>
    tpu.vector_store %arg5[%c0_32, %c0_33], %153 {strides = array<i32>} : memref<8x128xf32, #tpu.memory_space<vmem>>, vector<8x128xf32>,
    return
  }
}

</mosaic_0001>

<bundles_post_ra>
// kernel: down_forward.1
= control target key start
LH: loop header
LB: loop body
LE: loop exit
PB: predicated region body
PF: predicated region fallthrough
CT: control target
= control target key end

     0   :  { %v1858_v6 = vmov 0.0|0.0   ;;  %s1859_s26 = smov 7   ;;  %s1860_s27 = smov 9   ;;  %vm1867_vm0 = vmmov 0   ;;  %v1868_v8 = vmov 0.0   ;;  %v34_v9 = vlaneseq  ;;  %s2306_s0 = inlined_call_operand.vmem [shape: f32[4,8,128], index: 0, kind: input, shape index: {}]   ;;  %s2307_s1 = inlined_call_operand.vmem [shape: f32[9,128], index: 1, kind: input, shape index: {}]   ;;  %s2308_s2 = inlined_call_operand.vmem [shape: f32[8,72], index: 2, kind: input, shape index: {}]   ;;  %s2309_s4 = inlined_call_operand.vmem [shape: f32[2,8,3], index: 4, kind: input, shape index: {}]   ;;  %s2310_s3 = inlined_call_operand.vmem [shape: f32[8,72], index: 3, kind: input, shape index: {}]   ;;  %s2311_s5 = inlined_call_operand.vmem [shape: f32[8,128], index: 5, kind: output, shape index: {}]  }
   0x1   :  { %v20_v0 = vld [vmem:[%s2306_s0] sm:$0xff]  ;;  %v21_v1 = vld [vmem:[%s2306_s0 + $0x8] sm:$0xff]  ;;  %v22_v2 = vld [vmem:[%s2306_s0 + $0x10] sm:$0xff]  ;;  %1670 = vmatprep.subr.bf16.mxu0 %v1858_v6  ;;  %1742 = vmatprep.subr.bf16.mxu1 %v1858_v6  ;;  %s1861_s28 = smov 1   ;;  %s1862_s29 = smov 8   ;;  %vm93_vm1 = vcmask 588800  }
   0x2   :  { %v23_v3 = vld [vmem:[%s2306_s0 + $0x18] sm:$0xff]  ;;  %v24_v4 = vmax.f32 %v20_v0, %v21_v1  ;;  %s1863_s0 = smov 127   ;;  %s1864_s30 = smov 121   ;;  %1436 = vmatprep.mubr.msk.f32.mxu0 %vm1867_vm0, %v1868_v8  ;;  %1562 = vmatprep.mubr.msk.f32.mxu1 %vm1867_vm0, %v1868_v8  ;;  %v35_v10 = vshrl.u32 %v34_v9, 7  ;;  %v27_v12 = vld [vmem:[%s2307_s1] sm:$0xff] }
   0x3   :  { %v25_v5 = vmax.f32 %v22_v2, %v23_v3  ;;  %s1865_s6 = smov 120   ;;  %s1866_s7 = smov 119   ;;  %v31_v23 = vld [vmem:[%s2308_s2] sm:$0xff]  ;;  %v1989_v2 = vld [vmem:[%s2307_s1 + $0x8] ss:$0 sm:$0xff] }
   0x4   :  { %v36_v11 = vsub.s32 0, %v35_v10  ;;  %v43_v13 = vsub.s32 1, %v35_v10  ;;  %v57_v14 = vsub.s32 3, %v35_v10  ;;  %v50_v15 = vsub.s32 2, %v35_v10  ;;  %s1869_s14 = smov 126  }
   0x5   :  { %v26_v7 = vmax.f32 %v24_v4, %v25_v5  ;;  %v62_v20 = vsub.s32 4, %v35_v10  ;;  %v69_v22 = vsub.s32 5, %v35_v10  ;;  %v76_v29 = vsub.s32 6, %v35_v10 }
   0x6   :  { %v1931_v17 = vrot.slane %v27_v12, %v36_v11  ;;  %v1933_v19 = vrot.slane %v27_v12, %v43_v13  ;;  %v1935_v21 = vrot.slane %v27_v12, %v57_v14  ;;  %v1940_v24 = vrot.slane %v27_v12, %v50_v15 }
   0x7   :  { %46 = vrot.lane.b32.xlu1 %v26_v7, %s1859_s26  ;;  %32 = vrot.lane.b32.xlu0 %v26_v7, %s1860_s27  ;;  %v1944_v30 = vrot.slane %v27_v12, %v62_v20  ;;  %v1947_v32 = vrot.slane %v27_v12, %v69_v22  ;;  %v83_v33 = vsub.s32 7, %v35_v10  ;;  %v95_v34 = vsel %vm93_vm1, %v31_v23, 0 }
   0x8   :  { %v1951_v39 = vrot.slane %v27_v12, %v76_v29  ;;  %v1954_v41 = vand.u32 4294901760, %v95_v34 }
   0x9   :  { %v64_v40 = vmul.f32 %v1944_v30, %v26_v7  ;;  %v1959_v45 = vrot.slane %v27_v12, %v83_v33 }
   0xa   :  { %v1968_v52 = vsub.f32 %v95_v34, %v1954_v41 }
   0xb   :  { %53 = vrot.lane.b32.xlu1 %v26_v7, %s1861_s28  ;;  %39 = vrot.lane.b32.xlu0 %v26_v7, %s1862_s29  ;;  %v110_v51 = vand.u32 4294901760, %v64_v40 }
   0xc   :  { %v173_v60 = vand.u32 4294901760, %v1968_v52 }
   0xd   :  { %v1991_v4 = vsub.f32 %v64_v40, %v110_v51 }
   0xe   :  { %v174_v10 = vsub.f32 %v1968_v52, %v173_v60 }
   0xf   :  { %65 = vrot.lane.b32.xlu0 %v26_v7, %s1863_s0  ;;  %72 = vrot.lane.b32.xlu1 %v26_v7, %s1864_s30  ;;  %v212_v15 = vand.u32 4294901760, %v1991_v4 }
  0x10   :  { %v175_v23 = vand.u32 4294901760, %v174_v10 }
  0x11   :  { %v213_v29 = vsub.f32 %v1991_v4, %v212_v15 }
  0x13   :  { %79 = vrot.lane.b32.xlu0 %v26_v7, %s1865_s6  ;;  %86 = vrot.lane.b32.xlu1 %v26_v7, %s1866_s7 }
  0x79   :  { %v47_v16 = vpop.permute.xlu1 %46  ;;  %v33_v18 = vpop.permute.xlu0 %32 }
  0x7a   :  { %v38_v25 = vmul.f32 %v1931_v17, %v33_v18  ;;  %v52_v36 = vmul.f32 %v1940_v24, %v47_v16 }
  0x7c   :  { %v98_v37 = vand.u32 4294901760, %v38_v25  ;;  %v104_v47 = vand.u32 4294901760, %v52_v36 }
  0x7d   :  { %v54_v26 = vpop.permute.xlu1 %53  ;;  %v40_v27 = vpop.permute.xlu0 %39 }
  0x7e   :  { %v45_v28 = vmul.f32 %v1933_v19, %v40_v27  ;;  %v59_v31 = vmul.f32 %v1935_v21, %v54_v26  ;;  %v1964_v50 = vsub.f32 %v38_v25, %v98_v37  ;;  %v1982_v61 = vsub.f32 %v52_v36, %v104_v47 }
  0x80   :  { %v101_v35 = vand.u32 4294901760, %v45_v28  ;;  %v107_v42 = vand.u32 4294901760, %v59_v31  ;;  %v184_v62 = vand.u32 4294901760, %v1964_v50  ;;  %v198_v11 = vand.u32 4294901760, %v1982_v61 }
  0x81   :  { %v66_v38 = vpop.permute.xlu0 %65  ;;  %v73_v46 = vpop.permute.xlu1 %72 }
  0x82   :  { %v71_v43 = vmul.f32 %v1947_v32, %v66_v38  ;;  %v1957_v44 = vpack.c.bf16 %v101_v35, %v98_v37  ;;  %v1961_v48 = vsub.f32 %v45_v28, %v101_v35  ;;  %v78_v54 = vmul.f32 %v1951_v39, %v73_v46 }
  0x83   :  { %v1972_v56 = vpack.c.bf16 %v107_v42, %v104_v47  ;;  %v1974_v57 = vsub.f32 %v59_v31, %v107_v42  ;;  %v185_v12 = vsub.f32 %v1964_v50, %v184_v62  ;;  %v199_v25 = vsub.f32 %v1982_v61, %v198_v11 }
  0x84   :  { %1672 = vmatpush3.bf16.msra.mxu0 %v1957_v44  ;;  %v113_v53 = vand.u32 4294901760, %v71_v43  ;;  %v191_v58 = vand.u32 4294901760, %v1961_v48  ;;  %v116_v63 = vand.u32 4294901760, %v78_v54  ;;  %v214_v38 = vand.u32 4294901760, %v213_v29  ;;  %v680_v29 = vld [vmem:[%s2310_s3] sm:$0xff] }
  0x85   :  { %v80_v49 = vpop.permute.xlu0 %79  ;;  %1673 = vmatprep.subr.bf16.mxu0 %v1858_v6  ;;  %v205_v1 = vand.u32 4294901760, %v1974_v57  ;;  %v87_v3 = vpop.permute.xlu1 %86  ;;  %v186_v26 = vand.u32 4294901760, %v185_v12  ;;  %v200_v36 = vand.u32 4294901760, %v199_v25 }
  0x86   :  { %v85_v55 = vmul.f32 %v1959_v45, %v80_v49  ;;  %v1978_v59 = vpack.c.bf16 %v113_v53, %v110_v51  ;;  %v192_v5 = vsub.f32 %v1961_v48, %v191_v58  ;;  %v1996_v7 = vsub.f32 %v71_v43, %v113_v53 }
  0x87   :  { %v92_v13 = vmul.f32 %v1989_v2, %v87_v3  ;;  %v206_v14 = vsub.f32 %v1974_v57, %v205_v1  ;;  %v2015_v20 = vsub.f32 %v78_v54, %v116_v63  ;;  %v1698_v3 = vpack.c.bf16 %v1974_v57, %v1982_v61 }
  0x88   :  { %1675 = vmatpush3.bf16.msra.mxu0 %v1972_v56  ;;  %v119_v0 = vand.u32 4294901760, %v85_v55  ;;  %v193_v16 = vand.u32 4294901760, %v192_v5  ;;  %v219_v18 = vand.u32 4294901760, %v1996_v7  ;;  %v1701_v5 = vpack.c.bf16 %v1996_v7, %v1991_v4 }
  0x89   :  { %1676 = vmatprep.subr.bf16.mxu0 %v1858_v6  ;;  %v2024_v27 = vand.u32 4294901760, %v92_v13  ;;  %v207_v28 = vand.u32 4294901760, %v206_v14  ;;  %v226_v33 = vand.u32 4294901760, %v2015_v20  ;;  %v1719_v12 = vpack.c.bf16 %v191_v58, %v184_v62 }
  0x8a   :  { %v1999_v9 = vpack.c.bf16 %v119_v0, %v116_v63  ;;  %v2017_v22 = vsub.f32 %v85_v55, %v119_v0  ;;  %v220_v31 = vsub.f32 %v1996_v7, %v219_v18  ;;  %v1683_v35 = vpack.c.bf16 %v193_v16, %v186_v26 }
  0x8b   :  { %v2039_v37 = vsub.f32 %v92_v13, %v2024_v27  ;;  %v227_v42 = vsub.f32 %v2015_v20, %v226_v33  ;;  %v1686_v46 = vpack.c.bf16 %v207_v28, %v200_v36  ;;  %v1695_v0 = vpack.c.bf16 %v1961_v48, %v1964_v50 }
  0x8c   :  { %1678 = vmatpush3.bf16.msra.mxu0 %v1978_v59  ;;  %v233_v34 = vand.u32 4294901760, %v2017_v22  ;;  %v221_v40 = vand.u32 4294901760, %v220_v31  ;;  %v1704_v10 = vpack.c.bf16 %v2017_v22, %v2015_v20  ;;  %v1722_v13 = vpack.c.bf16 %v205_v1, %v198_v11 }
  0x8d   :  { %1679 = vmatprep.subr.bf16.mxu0 %v1858_v6  ;;  %v228_v47 = vand.u32 4294901760, %v227_v42  ;;  %v240_v51 = vand.u32 4294901760, %v2039_v37  ;;  %v1725_v48 = vpack.c.bf16 %v219_v18, %v212_v15  ;;  %v1870_v58 = vmov 0  }
  0x8e   :  { %v234_v43 = vsub.f32 %v2017_v22, %v233_v34  ;;  %v1689_v53 = vpack.c.bf16 %v221_v40, %v214_v38  ;;  %v1728_v50 = vpack.c.bf16 %v233_v34, %v226_v33  ;;  %1852 = vset.pattern.permute.xlu1 %v1870_v58 }
  0x8f   :  { %v241_v54 = vsub.f32 %v2039_v37, %v240_v51 }
  0x90   :  { %1681 = vmatpush3.bf16.msra.mxu0 %v1999_v9  ;;  %v235_v49 = vand.u32 4294901760, %v234_v43 }
  0x91   :  { %1434 = vmatprep.subr.mxu0 %v1868_v8  ;;  %v242_v63 = vand.u32 4294901760, %v241_v54 }
  0x92   :  { %v1692_v55 = vpack.c.bf16 %v235_v49, %v228_v47 }
  0x94   :  { %1435 = vmatpush3.msra.mxu0 %v2024_v27 }
  0x95   :  { %1682 = vmatprep.subr.bf16.mxu0 %v1858_v6  ;;  %1437 = vmatmul.mubr.f32.vlgmr.msra.gmra.mrb[0].mxu0 %v175_v23 }
  0x96   :  { %1684 = vmatpush3.bf16.msra.mxu0 %v1683_v35  ;;  %1457 = vmatprep.mubr.msk.f32.mxu0 %vm1867_vm0, %v1868_v8  ;;  %v707_v35 = vsel %vm93_vm1, %v680_v29, 0 }
  0x97   :  { %1685 = vmatprep.subr.bf16.mxu0 %v1858_v6  ;;  %v2141_v43 = vand.u32 4294901760, %v707_v35 }
  0x9a   :  { %1687 = vmatpush3.bf16.msra.mxu0 %v1686_v46 }
  0x9b   :  { %1688 = vmatprep.subr.bf16.mxu0 %v1858_v6 }
  0x9e   :  { %1690 = vmatpush3.bf16.msra.mxu0 %v1689_v53 }
  0x9f   :  { %1691 = vmatprep.subr.bf16.mxu0 %v1858_v6 }
  0xa2   :  { %1693 = vmatpush3.bf16.msra.mxu0 %v1692_v55  ;;  %v2153_v55 = vsub.f32 %v707_v35, %v2141_v43 }
  0xa3   :  { %1455 = vmatprep.subr.mxu0 %v1868_v8 }
  0xa6   :  { %1456 = vmatpush3.msra.mxu0 %v242_v63 }
  0xa7   :  { %1694 = vmatprep.subr.bf16.mxu0 %v1858_v6  ;;  %1458 = vmatmul.mubr.f32.vlgmr.msra.gmra.mrb[0].mxu0 %v1954_v41 }
  0xa8   :  { %1696 = vmatpush3.bf16.msra.mxu0 %v1695_v0  ;;  %1478 = vmatprep.mubr.msk.f32.mxu0 %vm1867_vm0, %v1868_v8 }
  0xa9   :  { %1697 = vmatprep.subr.bf16.mxu0 %v1858_v6 }
  0xac   :  { %1699 = vmatpush3.bf16.msra.mxu0 %v1698_v3 }
  0xad   :  { %1700 = vmatprep.subr.bf16.mxu0 %v1858_v6 }
  0xb0   :  { %1702 = vmatpush3.bf16.msra.mxu0 %v1701_v5 }
  0xb1   :  { %1703 = vmatprep.subr.bf16.mxu0 %v1858_v6 }
  0xb4   :  { %1705 = vmatpush3.bf16.msra.mxu0 %v1704_v10 }
  0xb5   :  { %1476 = vmatprep.subr.mxu0 %v1868_v8 }
  0xb8   :  { %1477 = vmatpush3.msra.mxu0 %v2039_v37 }
  0xb9   :  { %1706 = vmatprep.subr.bf16.mxu0 %v1858_v6  ;;  %1479 = vmatmul.mubr.f32.vlgmr.msra.gmra.mrb[0].mxu0 %v1968_v52 }
  0xba   :  { %1708 = vmatpush3.bf16.msra.mxu0 %v1957_v44  ;;  %1499 = vmatprep.mubr.msk.f32.mxu0 %vm1867_vm0, %v1868_v8 }
  0xbb   :  { %1709 = vmatprep.subr.bf16.mxu0 %v1858_v6 }
  0xbe   :  { %1711 = vmatpush3.bf16.msra.mxu0 %v1972_v56 }
  0xbf   :  { %1712 = vmatprep.subr.bf16.mxu0 %v1858_v6 }
  0xc2   :  { %1714 = vmatpush3.bf16.msra.mxu0 %v1978_v59 }
  0xc3   :  { %1715 = vmatprep.subr.bf16.mxu0 %v1858_v6 }
  0xc6   :  { %1717 = vmatpush3.bf16.msra.mxu0 %v1999_v9 }
  0xc7   :  { %1497 = vmatprep.subr.mxu0 %v1868_v8 }
  0xca   :  { %1498 = vmatpush3.msra.mxu0 %v2024_v27 }
  0xcb   :  { %1718 = vmatprep.subr.bf16.mxu0 %v1858_v6  ;;  %1500 = vmatmul.mubr.f32.vlgmr.msra.gmra.mrb[0].mxu0 %v173_v60 }
  0xcc   :  { %1720 = vmatpush3.bf16.msra.mxu0 %v1719_v12  ;;  %1520 = vmatprep.mubr.msk.f32.mxu0 %vm1867_vm0, %v1868_v8  ;;  %v785_v12 = vand.u32 4294901760, %v2153_v55 }
  0xcd   :  { %1721 = vmatprep.subr.bf16.mxu0 %v1858_v6 }
  0xd0   :  { %1723 = vmatpush3.bf16.msra.mxu0 %v1722_v13 }
  0xd1   :  { %1724 = vmatprep.subr.bf16.mxu0 %v1858_v6 }
  0xd4   :  { %1726 = vmatpush3.bf16.msra.mxu0 %v1725_v48 }
  0xd5   :  { %1727 = vmatprep.subr.bf16.mxu0 %v1858_v6 }
  0xd8   :  { %1729 = vmatpush3.bf16.msra.mxu0 %v1728_v50 }
  0xd9   :  { %1518 = vmatprep.subr.mxu0 %v1868_v8 }
  0xdc   :  { %1519 = vmatpush3.msra.mxu0 %v240_v51 }
  0xdd   :  { %1730 = vmatprep.subr.bf16.mxu0 %v1858_v6  ;;  %1521 = vmatmul.mubr.f32.vlgmr.msra.gmra.mrb[0].mxu0 %v1954_v41 }
  0xde   :  { %1732 = vmatpush3.bf16.msra.mxu0 %v1957_v44  ;;  %1541 = vmatprep.mubr.msk.f32.mxu0 %vm1867_vm0, %v1868_v8 }
  0xdf   :  { %1733 = vmatprep.subr.bf16.mxu0 %v1858_v6 }
  0xe2   :  { %1735 = vmatpush3.bf16.msra.mxu0 %v1972_v56  ;;  %v29_v56 = vld [vmem:[%s2309_s4] sm:$0xff] }
  0xe3   :  { %1736 = vmatprep.subr.bf16.mxu0 %v1858_v6 }
  0xe6   :  { %1738 = vmatpush3.bf16.msra.mxu0 %v1978_v59  ;;  %v1871_v59 = vmov 1  }
  0xe7   :  { %1739 = vmatprep.subr.bf16.mxu0 %v1858_v6  ;;  %1853 = vset.pattern.permute.xlu0 %v1871_v59  ;;  %v786_v59 = vsub.f32 %v2153_v55, %v785_v12 }
  0xea   :  { %1741 = vmatpush3.bf16.msra.mxu0 %v1999_v9 }
  0xeb   :  { %1539 = vmatprep.subr.mxu0 %v1868_v8 }
  0xee   :  { %1540 = vmatpush3.msra.mxu0 %v2024_v27 }
  0xef   :  { %1542 = vmatmul.mubr.f32.vlgmr.msra.gmra.mrb[0].mxu0 %v1954_v41 }
 0x1c2   :  { %v643_v44 = vpop.f32.mrb[0].mxu0 }
 0x1c3   :  { %647 = vadd.xlane.f32.xlu0 %v643_v44  ;;  %v1543_v52 = vpop.f32.mrb[1].mxu0  ;;  %v649_v57 = vmul.f32 %v643_v44, %v643_v44 }
 0x1c5   :  { %650 = vadd.xlane.f32.xlu1 %v649_v57 }
 0x1d9   :  { %673 = vrot.lane.b32.xlu0 %v29_v56, %s1869_s14 }
 0x1dd   :  { %668 = vperm.xlu0 %1853, %v29_v56  }
 0x250   :  { %v648_v60 = vpop.xlane.xlu0 %647 }
 0x251   :  { %v652_v61 = vmul.f32 0.0078125, %v648_v60 }
 0x252   :  { %v651_v41 = vpop.xlane.xlu1 %650 }
 0x253   :  { %v654_v62 = vmul.f32 %v652_v61, %v652_v61  ;;  %v653_v1 = vmul.f32 0.0078125, %v651_v41  ;;  %v659_v4 = vsub.f32 %v643_v44, %v652_v61 }
 0x254   :  { %v674_v7 = vpop.permute.xlu0 %673 }
 0x255   :  { %v655_v9 = vsub.f32 %v653_v1, %v654_v62  ;;  %1834 = vpush %v674_v7 }
 0x257   :  { %v656_v11 = vadd.f32 1e-05, %v655_v9 }
 0x259   :  { %1854 = vrsqrt.f32 %v656_v11  ;;  %v787_v11 = vand.u32 4294901760, %v786_v59 }
 0x25c   :  { %v669_v18 = vpop.permute.xlu0 %668 }
 0x263   :  { %v1855_v14 = vpop.eup %1854 }
 0x264   :  { %v658_v15 = vmul.f32 %v1855_v14, %v29_v56 }
 0x266   :  { %662 = vperm.xlu1 %1852, %v658_v15  }
 0x286   :  { %s1835_s15 = spop %1834 }
 0x287   :  { %v676_v22 = vstv %s1835_s15 }
 0x2e5   :  { %v663_v16 = vpop.permute.xlu1 %662 }
 0x2e6   :  { %v665_v20 = vmul.f32 %v663_v16, %v659_v4 }
 0x2e8   :  { %v671_v23 = vadd.f32 %v669_v18, %v665_v20 }
 0x2ea   :  { %vm672_vm2 = vcmp.gt.f32.partialorder %v671_v23, 0.0  ;;  %v678_v25 = vmul.f32 %v676_v22, %v671_v23 }
 0x2ec   :  { %v679_v26 = vsel %vm672_vm2, %v671_v23, %v678_v25 }
 0x2ed   :  { %687 = vrot.lane.b32.xlu0 %v679_v26, %s1859_s26  ;;  %681 = vrot.lane.b32.xlu1 %v679_v26, %s1860_s27  ;;  %v693_v54 = vmul.f32 %v679_v26, %v1944_v30 }
 0x2ef   :  { %v722_v30 = vand.u32 4294901760, %v693_v54 }
 0x2f1   :  { %694 = vrot.lane.b32.xlu0 %v679_v26, %s1863_s0  ;;  %684 = vrot.lane.b32.xlu1 %v679_v26, %s1862_s29  ;;  %v2179_v58 = vsub.f32 %v693_v54, %v722_v30 }
 0x2f3   :  { %v824_v14 = vand.u32 4294901760, %v2179_v58 }
 0x2f5   :  { %700 = vrot.lane.b32.xlu0 %v679_v26, %s1865_s6  ;;  %690 = vrot.lane.b32.xlu1 %v679_v26, %s1861_s28 }
 0x2f9   :  { %697 = vrot.lane.b32.xlu1 %v679_v26, %s1864_s30 }
 0x2fd   :  { %703 = vrot.lane.b32.xlu1 %v679_v26, %s1866_s7 }
 0x35f   :  { %v682_v27 = vpop.permute.xlu1 %681  ;;  %v688_v28 = vpop.permute.xlu0 %687 }
 0x360   :  { %v683_v31 = vmul.f32 %v682_v27, %v1931_v17  ;;  %v689_v38 = vmul.f32 %v688_v28, %v1940_v24  ;;  %v825_v28 = vsub.f32 %v2179_v58, %v824_v14 }
 0x362   :  { %v710_v40 = vand.u32 4294901760, %v683_v31  ;;  %v716_v17 = vand.u32 4294901760, %v689_v38 }
 0x363   :  { %v685_v33 = vpop.permute.xlu1 %684  ;;  %v695_v36 = vpop.permute.xlu0 %694 }
 0x364   :  { %v686_v34 = vmul.f32 %v685_v33, %v1933_v19  ;;  %v696_v46 = vmul.f32 %v695_v36, %v1947_v32  ;;  %v2155_v32 = vsub.f32 %v683_v31, %v710_v40  ;;  %v2167_v13 = vsub.f32 %v689_v38, %v716_v17 }
 0x365   :  { %v826_v36 = vand.u32 4294901760, %v825_v28 }
 0x366   :  { %v713_v37 = vand.u32 4294901760, %v686_v34  ;;  %v796_v48 = vand.u32 4294901760, %v2155_v32  ;;  %v810_v60 = vand.u32 4294901760, %v2167_v13 }
 0x367   :  { %v691_v42 = vpop.permute.xlu1 %690  ;;  %v701_v24 = vpop.permute.xlu0 %700 }
 0x368   :  { %v692_v47 = vmul.f32 %v691_v42, %v1935_v21  ;;  %v2145_v49 = vpack.c.bf16 %v713_v37, %v710_v40  ;;  %v2147_v51 = vsub.f32 %v686_v34, %v713_v37  ;;  %v725_v21 = vand.u32 4294901760, %v696_v46 }
 0x369   :  { %v702_v5 = vmul.f32 %v701_v24, %v1959_v45  ;;  %v797_v61 = vsub.f32 %v2155_v32, %v796_v48 }
 0x36a   :  { %v719_v19 = vand.u32 4294901760, %v692_v47  ;;  %1744 = vmatpush3.bf16.msra.mxu1 %v2145_v49  ;;  %v803_v3 = vand.u32 4294901760, %v2147_v51  ;;  %v2170_v50 = vpack.c.bf16 %v725_v21, %v722_v30  ;;  %v2172_v52 = vsub.f32 %v696_v46, %v725_v21 }
 0x36b   :  { %v698_v53 = vpop.permute.xlu1 %697  ;;  %1745 = vmatprep.subr.bf16.mxu1 %v1858_v6  ;;  %v731_v57 = vand.u32 4294901760, %v702_v5  ;;  %v798_v15 = vand.u32 4294901760, %v797_v61 }
 0x36c   :  { %v699_v63 = vmul.f32 %v698_v53, %v1951_v39  ;;  %v2158_v0 = vpack.c.bf16 %v719_v19, %v716_v17  ;;  %v2162_v10 = vsub.f32 %v692_v47, %v719_v19  ;;  %v804_v45 = vsub.f32 %v2147_v51, %v803_v3 }
 0x36d   :  { %v831_v1 = vand.u32 4294901760, %v2172_v52  ;;  %v2204_v16 = vsub.f32 %v702_v5, %v731_v57  ;;  %v1767_v19 = vpack.c.bf16 %v2147_v51, %v2155_v32  ;;  %v1773_v54 = vpack.c.bf16 %v2172_v52, %v2179_v58 }
 0x36e   :  { %1747 = vmatpush3.bf16.msra.mxu1 %v2158_v0  ;;  %v728_v39 = vand.u32 4294901760, %v699_v63  ;;  %v817_v56 = vand.u32 4294901760, %v2162_v10  ;;  %v805_v4 = vand.u32 4294901760, %v804_v45  ;;  %v1770_v53 = vpack.c.bf16 %v2162_v10, %v2167_v13 }
 0x36f   :  { %1748 = vmatprep.subr.bf16.mxu1 %v1858_v6  ;;  %v704_v44 = vpop.permute.xlu1 %703  ;;  %v832_v20 = vsub.f32 %v2172_v52, %v831_v1  ;;  %v845_v27 = vand.u32 4294901760, %v2204_v16  ;;  %v1791_v21 = vpack.c.bf16 %v803_v3, %v796_v48  ;;  %v1797_v51 = vpack.c.bf16 %v831_v1, %v824_v14 }
 0x370   :  { %v705_v41 = vmul.f32 %v1989_v2, %v704_v44  ;;  %v2190_v62 = vpack.c.bf16 %v731_v57, %v728_v39  ;;  %v818_v7 = vsub.f32 %v2162_v10, %v817_v56  ;;  %v2196_v9 = vsub.f32 %v699_v63, %v728_v39 }
 0x371   :  { %v811_v2 = vsub.f32 %v2167_v13, %v810_v60  ;;  %v1755_v25 = vpack.c.bf16 %v805_v4, %v798_v15  ;;  %v833_v29 = vand.u32 4294901760, %v832_v20  ;;  %v846_v35 = vsub.f32 %v2204_v16, %v845_v27 }
 0x372   :  { %1750 = vmatpush3.bf16.msra.mxu1 %v2170_v50  ;;  %v2206_v18 = vand.u32 4294901760, %v705_v41  ;;  %v819_v22 = vand.u32 4294901760, %v818_v7  ;;  %v838_v23 = vand.u32 4294901760, %v2196_v9  ;;  %v1776_v24 = vpack.c.bf16 %v2204_v16, %v2196_v9 }
 0x373   :  { %1751 = vmatprep.subr.bf16.mxu1 %v1858_v6  ;;  %v812_v26 = vand.u32 4294901760, %v811_v2  ;;  %v1761_v40 = vpack.c.bf16 %v833_v29, %v826_v36  ;;  %v847_v42 = vand.u32 4294901760, %v846_v35  ;;  %v1794_v63 = vpack.c.bf16 %v817_v56, %v810_v60 }
 0x374   :  { %v839_v31 = vsub.f32 %v2196_v9, %v838_v23  ;;  %v851_v33 = vsub.f32 %v705_v41, %v2206_v18 }
 0x375   :  { %v1758_v34 = vpack.c.bf16 %v819_v22, %v812_v26 }
 0x376   :  { %1753 = vmatpush3.bf16.msra.mxu1 %v2190_v62  ;;  %v840_v37 = vand.u32 4294901760, %v839_v31  ;;  %v852_v38 = vand.u32 4294901760, %v851_v33 }
 0x377   :  { %1560 = vmatprep.subr.mxu1 %v1868_v8 }
 0x378   :  { %v853_v46 = vsub.f32 %v851_v33, %v852_v38  ;;  %v1764_v47 = vpack.c.bf16 %v847_v42, %v840_v37 }
 0x37a   :  { %1561 = vmatpush3.msra.mxu1 %v2206_v18  ;;  %v854_v17 = vand.u32 4294901760, %v853_v46 }
 0x37b   :  { %1754 = vmatprep.subr.bf16.mxu1 %v1858_v6  ;;  %1563 = vmatmul.mubr.f32.vlgmr.msra.gmra.mrb[0].mxu1 %v787_v11 }
 0x37c   :  { %1756 = vmatpush3.bf16.msra.mxu1 %v1755_v25  ;;  %1583 = vmatprep.mubr.msk.f32.mxu1 %vm1867_vm0, %v1868_v8 }
 0x37d   :  { %1757 = vmatprep.subr.bf16.mxu1 %v1858_v6 }
 0x380   :  { %1759 = vmatpush3.bf16.msra.mxu1 %v1758_v34 }
 0x381   :  { %1760 = vmatprep.subr.bf16.mxu1 %v1858_v6 }
 0x384   :  { %1762 = vmatpush3.bf16.msra.mxu1 %v1761_v40 }
 0x385   :  { %1763 = vmatprep.subr.bf16.mxu1 %v1858_v6 }
 0x388   :  { %1765 = vmatpush3.bf16.msra.mxu1 %v1764_v47 }
 0x389   :  { %1581 = vmatprep.subr.mxu1 %v1868_v8 }
 0x38c   :  { %1582 = vmatpush3.msra.mxu1 %v854_v17 }
 0x38d   :  { %1766 = vmatprep.subr.bf16.mxu1 %v1858_v6  ;;  %1584 = vmatmul.mubr.f32.vlgmr.msra.gmra.mrb[0].mxu1 %v2141_v43 }
 0x38e   :  { %1768 = vmatpush3.bf16.msra.mxu1 %v1767_v19  ;;  %1604 = vmatprep.mubr.msk.f32.mxu1 %vm1867_vm0, %v1868_v8 }
 0x38f   :  { %1769 = vmatprep.subr.bf16.mxu1 %v1858_v6 }
 0x392   :  { %1771 = vmatpush3.bf16.msra.mxu1 %v1770_v53 }
 0x393   :  { %1772 = vmatprep.subr.bf16.mxu1 %v1858_v6 }
 0x396   :  { %1774 = vmatpush3.bf16.msra.mxu1 %v1773_v54 }
 0x397   :  { %1775 = vmatprep.subr.bf16.mxu1 %v1858_v6 }
 0x39a   :  { %1777 = vmatpush3.bf16.msra.mxu1 %v1776_v24 }
 0x39b   :  { %1602 = vmatprep.subr.mxu1 %v1868_v8 }
 0x39e   :  { %1603 = vmatpush3.msra.mxu1 %v851_v33 }
 0x39f   :  { %1778 = vmatprep.subr.bf16.mxu1 %v1858_v6  ;;  %1605 = vmatmul.mubr.f32.vlgmr.msra.gmra.mrb[0].mxu1 %v2153_v55  ;;  %v1800_v55 = vpack.c.bf16 %v845_v27, %v838_v23 }
 0x3a0   :  { %1780 = vmatpush3.bf16.msra.mxu1 %v2145_v49  ;;  %1625 = vmatprep.mubr.msk.f32.mxu1 %vm1867_vm0, %v1868_v8 }
 0x3a1   :  { %1781 = vmatprep.subr.bf16.mxu1 %v1858_v6 }
 0x3a4   :  { %1783 = vmatpush3.bf16.msra.mxu1 %v2158_v0 }
 0x3a5   :  { %1784 = vmatprep.subr.bf16.mxu1 %v1858_v6 }
 0x3a8   :  { %1786 = vmatpush3.bf16.msra.mxu1 %v2170_v50 }
 0x3a9   :  { %1787 = vmatprep.subr.bf16.mxu1 %v1858_v6 }
 0x3ac   :  { %1789 = vmatpush3.bf16.msra.mxu1 %v2190_v62 }
 0x3ad   :  { %1623 = vmatprep.subr.mxu1 %v1868_v8 }
 0x3b0   :  { %1624 = vmatpush3.msra.mxu1 %v2206_v18 }
 0x3b1   :  { %1790 = vmatprep.subr.bf16.mxu1 %v1858_v6  ;;  %1626 = vmatmul.mubr.f32.vlgmr.msra.gmra.mrb[0].mxu1 %v785_v12 }
 0x3b2   :  { %1792 = vmatpush3.bf16.msra.mxu1 %v1791_v21  ;;  %1646 = vmatprep.mubr.msk.f32.mxu1 %vm1867_vm0, %v1868_v8 }
 0x3b3   :  { %1793 = vmatprep.subr.bf16.mxu1 %v1858_v6 }
 0x3b6   :  { %1795 = vmatpush3.bf16.msra.mxu1 %v1794_v63 }
 0x3b7   :  { %1796 = vmatprep.subr.bf16.mxu1 %v1858_v6 }
 0x3ba   :  { %1798 = vmatpush3.bf16.msra.mxu1 %v1797_v51 }
 0x3bb   :  { %1799 = vmatprep.subr.bf16.mxu1 %v1858_v6 }
 0x3be   :  { %1801 = vmatpush3.bf16.msra.mxu1 %v1800_v55 }
 0x3bf   :  { %1644 = vmatprep.subr.mxu1 %v1868_v8 }
 0x3c2   :  { %1645 = vmatpush3.msra.mxu1 %v852_v38 }
 0x3c3   :  { %1802 = vmatprep.subr.bf16.mxu1 %v1858_v6  ;;  %1647 = vmatmul.mubr.f32.vlgmr.msra.gmra.mrb[0].mxu1 %v2141_v43 }
 0x3c4   :  { %1804 = vmatpush3.bf16.msra.mxu1 %v2145_v49  ;;  %1667 = vmatprep.mubr.msk.f32.mxu1 %vm1867_vm0, %v1868_v8 }
 0x3c5   :  { %1805 = vmatprep.subr.bf16.mxu1 %v1858_v6 }
 0x3c8   :  { %1807 = vmatpush3.bf16.msra.mxu1 %v2158_v0  ;;  %v30_v0 = vld [vmem:[%s2309_s4 + $0x8] sm:$0xff] }
 0x3c9   :  { %1808 = vmatprep.subr.bf16.mxu1 %v1858_v6 }
 0x3cc   :  { %1810 = vmatpush3.bf16.msra.mxu1 %v2170_v50 }
 0x3cd   :  { %1811 = vmatprep.subr.bf16.mxu1 %v1858_v6 }
 0x3d0   :  { %1813 = vmatpush3.bf16.msra.mxu1 %v2190_v62 }
 0x3d1   :  { %1665 = vmatprep.subr.mxu1 %v1868_v8 }
 0x3d4   :  { %1666 = vmatpush3.msra.mxu1 %v2206_v18 }
 0x3d5   :  { %1668 = vmatmul.mubr.f32.vlgmr.msra.gmra.mrb[0].mxu1 %v2141_v43 }
 0x4a8   :  { %v1255_v49 = vpop.f32.mrb[0].mxu1 }
 0x4a9   :  { %1259 = vadd.xlane.f32.xlu0 %v1255_v49  ;;  %v1669_v32 = vpop.f32.mrb[1].mxu1  ;;  %v1261_v3 = vmul.f32 %v1255_v49, %v1255_v49 }
 0x4ab   :  { %1262 = vadd.xlane.f32.xlu1 %v1261_v3 }
 0x4bf   :  { %1285 = vrot.lane.b32.xlu0 %v30_v0, %s1869_s14 }
 0x4c3   :  { %1280 = vperm.xlu0 %1853, %v30_v0  }
 0x536   :  { %v1260_v6 = vpop.xlane.xlu0 %1259 }
 0x537   :  { %v1264_v5 = vmul.f32 0.0078125, %v1260_v6 }
 0x538   :  { %v1263_v10 = vpop.xlane.xlu1 %1262 }
 0x539   :  { %v1266_v8 = vmul.f32 %v1264_v5, %v1264_v5  ;;  %v1265_v30 = vmul.f32 0.0078125, %v1263_v10  ;;  %v1271_v12 = vsub.f32 %v1255_v49, %v1264_v5 }
 0x53a   :  { %v1286_v13 = vpop.permute.xlu0 %1285 }
 0x53b   :  { %v1267_v43 = vsub.f32 %v1265_v30, %v1266_v8  ;;  %1836 = vpush %v1286_v13 }
 0x53d   :  { %v1268_v48 = vadd.f32 1e-05, %v1267_v43 }
 0x53f   :  { %1856 = vrsqrt.f32 %v1268_v48 }
 0x542   :  { %v1281_v45 = vpop.permute.xlu0 %1280 }
 0x549   :  { %v1857_v39 = vpop.eup %1856 }
 0x54a   :  { %v1270_v50 = vmul.f32 %v1857_v39, %v30_v0 }
 0x54c   :  { %1274 = vperm.xlu1 %1852, %v1270_v50  }
 0x56c   :  { %s1837_s19 = spop %1836 }
 0x56d   :  { %v1288_v57 = vstv %s1837_s19 }
 0x5cb   :  { %v1275_v44 = vpop.permute.xlu1 %1274 }
 0x5cc   :  { %v1277_v52 = vmul.f32 %v1275_v44, %v1271_v12 }
 0x5ce   :  { %v1283_v56 = vadd.f32 %v1281_v45, %v1277_v52 }
 0x5d0   :  { %vm1284_vm3 = vcmp.gt.f32.partialorder %v1283_v56, 0.0  ;;  %v1290_v58 = vmul.f32 %v1288_v57, %v1283_v56 }
 0x5d2   :  { %v1291_v59 = vsel %vm1284_vm3, %v1283_v56, %v1290_v58 }
 0x5d3   :  { %1292 = vst [vmem:[%s2311_s5] sm:$0xff] %v1291_v59 }

</bundles_post_ra>
